<compile_context>
chip_gen: v6e
topology: v6e:2x2x1
jax: 0.10.0
libtpu: 0.0.40
codegen_flags: <defaults>
</compile_context>

<pallas_src>
import functools

import jax
import jax.numpy as jnp
from jax.experimental import pallas as pl
from jax.experimental.pallas import tpu as pltpu


def dense_bottleneck_kernel(x_ref, scale1_ref, shift1_ref, w1_ref, shift2_ref,
                            w2f_ref, out_ref, xprev_ref, zprev_ref, ztail_ref,
                            *, kernel_size, pad, in_channels, n_tiles):
    """Grid step (b, t): compute z of L-tile t, emit output of L-tile t-1.

    x_ref      : (1, Cin, Lt)   input tile min(t, n_tiles-1), f32
    scale1/shift1 : (Cin, 1)    folded BN1 (gamma/sqrt(var+eps), beta - mean*scale), f32
    w1_ref     : (Cb, Cin)      1x1 conv weight with BN2 scale folded in, compute dtype
    shift2_ref : (Cb, 1)        folded BN2 shift, f32
    w2f_ref    : (G, K*Cb)      flattened K-tap weight, w2f[g, k*Cb+c] = w2[g, c, k]
    out_ref    : (1, Cin+G, Lt) fused output tile max(t-1, 0): [x ; new_features]
    xprev_ref  : (Cin, Lt)      carried x of tile t-1 (for the concat passthrough)
    zprev_ref  : (Cb, Lt)       carried z of tile t-1 (compute dtype)
    ztail_ref  : (Cb, pad)      carried last `pad` columns of z of tile t-2
    """
    t = pl.program_id(1)
    cdt = w1_ref.dtype                      # matmul compute dtype (bf16 or f32)
    x = x_ref[0]                            # (Cin, Lt) f32
    lt = x.shape[1]
    cin = in_channels
    g = w2f_ref.shape[0]

    # ---- BN1 -> ReLU (f32 VPU) -> 1x1 conv on MXU (BN2 scale folded into w1) ----
    y = jnp.maximum(x * scale1_ref[...] + shift1_ref[...], 0.0)          # (Cin, Lt)
    h = jnp.dot(w1_ref[...], y.astype(cdt),
                preferred_element_type=jnp.float32)                      # (Cb, Lt) f32
    # ---- BN2 shift -> ReLU (f32) ----
    z = jnp.maximum(h + shift2_ref[...], 0.0)                            # (Cb, Lt) f32
    z_c = z.astype(cdt)

    # ---- Emit output of tile t-1 (delayed one step so its right halo is known) ----
    @pl.when(t > 0)
    def _emit():
        z_prev = zprev_ref[...]                              # z of tile t-1 (Cb, Lt)
        if pad > 0:
            left = ztail_ref[...]                            # tail of tile t-2 (zeros at t==1)
            head_scale = (t < n_tiles).astype(jnp.float32)   # no tile t past the end
            right = (z[:, :pad] * head_scale).astype(cdt)    # head of tile t (or zeros)
            zh = jnp.concatenate([left, z_prev, right], axis=1)   # (Cb, Lt + 2*pad)
        else:
            zh = z_prev
        # K lane-shifted views stacked along sublanes -> ONE fused MXU matmul.
        stacked = jnp.concatenate(
            [zh[:, k:k + lt] for k in range(kernel_size)], axis=0)       # (K*Cb, Lt)
        nf = jnp.dot(w2f_ref[...], stacked,
                     preferred_element_type=jnp.float32)                 # (G, Lt) f32
        # Fused dense-shortcut concat: passthrough rows + new-feature rows.
        # (Cin, G multiples of 8 -> aligned, unmasked sublane stores.)
        out_ref[0, pl.ds(0, cin), :] = xprev_ref[...].astype(out_ref.dtype)
        out_ref[0, pl.ds(cin, g), :] = nf.astype(out_ref.dtype)

    # ---- Update carried state for the next step ----
    if pad > 0:
        @pl.when(t == 0)
        def _init_tail():
            ztail_ref[...] = jnp.zeros_like(ztail_ref)

        @pl.when(t > 0)
        def _roll_tail():
            ztail_ref[...] = zprev_ref[:, lt - pad:]   # tail of tile t-1, for step t+1
    zprev_ref[...] = z_c
    xprev_ref[...] = x


def dense_bottleneck_forward(x_ncl, scale1, shift1, w1_eff, shift2, w2_flat,
                             kernel_size, *, l_tile=256,
                             compute_dtype=jnp.bfloat16):
    """x_ncl: (B, Cin, L) f32 -> (B, Cin + G, L) f32.

    Pre-folded weights:
      w1_eff  = w1[:, :, 0] * bn2_scale[:, None]   # (Cb, Cin)
      w2_flat[g, k*Cb + c] = w2[g, c, k]           # (G, K*Cb)
    """
    B, Cin, L = x_ncl.shape
    Cb = w1_eff.shape[0]
    G, KCb = w2_flat.shape
    assert KCb == kernel_size * Cb
    assert kernel_size % 2 == 1, "even filter_length 'same' padding not supported"
    pad = (kernel_size - 1) // 2

    # L-tile: multiple of 128 lanes -> N>=256 feeds the 256-wide MXU (v6e/v7x)
    # and keeps per-step VMEM ~ 2*(x+out blocks) + (Cb,Lt) scratch, far under the
    # v7x 32 MiB scoped default even for large Cin.
    lt = min(l_tile, L)
    if L % lt != 0:            # fall back to a single full-length tile per row
        lt = L
    n_tiles = L // lt

    w1_c = w1_eff.astype(compute_dtype)
    w2_c = w2_flat.astype(compute_dtype)

    kernel = functools.partial(dense_bottleneck_kernel,
                               kernel_size=kernel_size, pad=pad,
                               in_channels=Cin, n_tiles=n_tiles)

    out = pl.pallas_call(
        kernel,
        out_shape=jax.ShapeDtypeStruct((B, Cin + G, L), x_ncl.dtype),
        grid_spec=pltpu.PrefetchScalarGridSpec(
            num_scalar_prefetch=0,
            grid=(B, n_tiles + 1),        # +1 flush step per batch row
            in_specs=[
                # x tile (clamped: the flush step just reloads the last tile)
                pl.BlockSpec((1, Cin, lt),
                             lambda b, t: (b, 0, jnp.minimum(t, n_tiles - 1))),
                pl.BlockSpec((Cin, 1), lambda b, t: (0, 0)),
                pl.BlockSpec((Cin, 1), lambda b, t: (0, 0)),
                pl.BlockSpec((Cb, Cin), lambda b, t: (0, 0)),
                pl.BlockSpec((Cb, 1), lambda b, t: (0, 0)),
                pl.BlockSpec((G, KCb), lambda b, t: (0, 0)),
            ],
            # output lags the tile axis by one step (same block at t=0,1 -> only
            # the fully-written t>=1 content is stored back)
            out_specs=pl.BlockSpec((1, Cin + G, lt),
                                   lambda b, t: (b, 0, jnp.maximum(t - 1, 0))),
            scratch_shapes=[
                pltpu.VMEM((Cin, lt), x_ncl.dtype),             # previous x tile
                pltpu.VMEM((Cb, lt), compute_dtype),            # previous z tile
                pltpu.VMEM((Cb, max(pad, 1)), compute_dtype),   # tail of tile t-2
            ],
        ),
        compiler_params=pltpu.CompilerParams(
            dimension_semantics=("parallel", "arbitrary")),
    )(x_ncl,
      scale1.reshape(Cin, 1), shift1.reshape(Cin, 1),
      w1_c,
      shift2.reshape(Cb, 1),
      w2_c)
    return out


def reference_forward(x, gamma1, beta1, mean1, var1, w1_pt,
                      gamma2, beta2, mean2, var2, w2_pt, eps, kernel_size):
    """Pure-JAX reference mirroring the PyTorch forward (inference BN, NCL)."""
    pad = (kernel_size - 1) // 2
    B, Cin, L = x.shape
    s1 = gamma1 / jnp.sqrt(var1 + eps)
    b1 = beta1 - mean1 * s1
    y = jnp.maximum(x * s1[None, :, None] + b1[None, :, None], 0.0)
    h = jnp.einsum('oc,bcl->bol', w1_pt[:, :, 0], y)            # 1x1 conv
    s2 = gamma2 / jnp.sqrt(var2 + eps)
    b2 = beta2 - mean2 * s2
    z = jnp.maximum(h * s2[None, :, None] + b2[None, :, None], 0.0)
    zp = jnp.pad(z, ((0, 0), (0, 0), (pad, pad)))
    nf = jnp.zeros((B, w2_pt.shape[0], L), jnp.float32)
    for k in range(kernel_size):
        nf = nf + jnp.einsum('gc,bcl->bgl', w2_pt[:, :, k], zp[:, :, k:k + L])
    return jnp.concatenate([x, nf], axis=1)


if __name__ == "__main__":
    # Module hyper-parameters (consistent with the PyTorch __init__)
    batch_size    = 2
    in_channels   = 8
    growth_rate   = 8
    bn_size       = 4
    filter_length = 3            # odd -> "same" length (compute_output_shape)
    seq_len       = 1024         # ECG-like length; tiled into 256-lane blocks
    bottleneck    = bn_size * growth_rate   # 32
    eps = 1e-5

    key = jax.random.PRNGKey(0)
    kx, kw1, kw2 = jax.random.split(key, 3)

    # Input, PyTorch NCL layout
    x = jax.random.normal(kx, (batch_size, in_channels, seq_len), jnp.float32)

    # Deterministic BatchNorm parameters (inference mode)
    gamma1 = 1.0 + 0.10 * jnp.arange(in_channels, dtype=jnp.float32)
    beta1  = 0.05 * jnp.arange(in_channels, dtype=jnp.float32)
    mean1  = 0.01 * jnp.arange(in_channels, dtype=jnp.float32)
    var1   = 1.0 + 0.02 * jnp.arange(in_channels, dtype=jnp.float32)

    gamma2 = 1.0 + 0.05 * jnp.arange(bottleneck, dtype=jnp.float32)
    beta2  = -0.02 * jnp.arange(bottleneck, dtype=jnp.float32)
    mean2  = 0.005 * jnp.arange(bottleneck, dtype=jnp.float32)
    var2   = 1.0 + 0.01 * jnp.arange(bottleneck, dtype=jnp.float32)

    # Conv weights (bias=False). PyTorch shapes: w1_pt (Cb, Cin, 1), w2_pt (G, Cb, K)
    w1_pt = 0.2 * jax.random.normal(kw1, (bottleneck, in_channels, 1), jnp.float32)
    w2_pt = 0.2 * jax.random.normal(kw2, (growth_rate, bottleneck, filter_length),
                                    jnp.float32)

    # Trace-time folding: BN -> scale/shift, BN2 scale into w1, w2 flattened
    # tap-major along the contraction axis for the single fused conv matmul.
    scale1 = gamma1 / jnp.sqrt(var1 + eps)
    shift1 = beta1 - mean1 * scale1
    scale2 = gamma2 / jnp.sqrt(var2 + eps)
    shift2 = beta2 - mean2 * scale2
    w1_eff = w1_pt[:, :, 0] * scale2[:, None]                       # (Cb, Cin)
    w2_flat = jnp.transpose(w2_pt, (0, 2, 1)).reshape(
        growth_rate, filter_length * bottleneck)                    # (G, K*Cb)

    ref = reference_forward(x, gamma1, beta1, mean1, var1, w1_pt,
                            gamma2, beta2, mean2, var2, w2_pt, eps,
                            filter_length)

    # f32 compute path: tight check of the tiling / halo / fused-concat structure.
    out_f32 = dense_bottleneck_forward(x, scale1, shift1, w1_eff, shift2, w2_flat,
                                       filter_length, l_tile=256,
                                       compute_dtype=jnp.float32)
    out_f32 = jax.block_until_ready(out_f32)
    assert out_f32.shape == (batch_size, in_channels + growth_rate, seq_len), \
        out_f32.shape
    assert jnp.allclose(out_f32, ref, atol=1e-3, rtol=1e-3), \
        float(jnp.max(jnp.abs(out_f32 - ref)))

    # bf16 matmul-operand path (default): halves MXU passes & operand footprint;
    # elementwise BN/ReLU and accumulation stay f32.  Looser tolerance per review.
    out_bf16 = dense_bottleneck_forward(x, scale1, shift1, w1_eff, shift2, w2_flat,
                                        filter_length, l_tile=256,
                                        compute_dtype=jnp.bfloat16)
    out_bf16 = jax.block_until_ready(out_bf16)
    assert out_bf16.shape == (batch_size, in_channels + growth_rate, seq_len), \
        out_bf16.shape
    assert jnp.allclose(out_bf16, ref, atol=2e-2, rtol=2e-2), \
        float(jnp.max(jnp.abs(out_bf16 - ref)))

    print("KERNEL_OK")
</pallas_src>

<mosaic_0001>
module attributes {stable_mosaic.version = 11 : i64} {
  func.func @dense_bottleneck_kernel(%arg0: i32, %arg1: i32, %arg2: memref<1x8x256xf32, #tpu.memory_space<vmem>>, %arg3: memref<8x1xf32, #tpu.memory_space<vmem>>, %arg4: memref<8x1xf32, #tpu.memory_space<vmem>>, %arg5: memref<32x8xf32, #tpu.memory_space<vmem>>, %arg6: memref<32x1xf32, #tpu.memory_space<vmem>>, %arg7: memref<8x96xf32, #tpu.memory_space<vmem>>, %arg8: memref<1x16x256xf32, #tpu.memory_space<vmem>>, %arg9: memref<8x256xf32, #tpu.memory_space<vmem>>, %arg10: memref<32x256xf32, #tpu.memory_space<vmem>>, %arg11: memref<32x1xf32, #tpu.memory_space<vmem>>) attributes {dimension_semantics = [#tpu.dimension_semantics<parallel>, #tpu.dimension_semantics<arbitrary>], iteration_bounds = array<i64: 2, 5>, scalar_prefetch = 0 : i64, scratch_operands = 3 : i64, tpu.core_type = #tpu.core_type<tc>, window_params = [{transform_indices = @transform_0, window_bounds = array<i64: 1, 8, 256>}, {pipeline_mode = #tpu.pipeline_mode<synchronous>, transform_indices = @transform_1, window_bounds = array<i64: 8, 1>}, {pipeline_mode = #tpu.pipeline_mode<synchronous>, transform_indices = @transform_2, window_bounds = array<i64: 8, 1>}, {pipeline_mode = #tpu.pipeline_mode<synchronous>, transform_indices = @transform_3, window_bounds = array<i64: 32, 8>}, {pipeline_mode = #tpu.pipeline_mode<synchronous>, transform_indices = @transform_4, window_bounds = array<i64: 32, 1>}, {pipeline_mode = #tpu.pipeline_mode<synchronous>, transform_indices = @transform_5, window_bounds = array<i64: 8, 96>}, {transform_indices = @transform_6, window_bounds = array<i64: 1, 16, 256>}]} {
    %c0 = arith.constant 0 : index
    %c0_0 = arith.constant 0 : index
    %c0_1 = arith.constant 0 : index
    %0 = vector.load %arg2[%c0, %c0_0, %c0_1] : memref<1x8x256xf32, #tpu.memory_space<vmem>>, vector<1x8x256xf32>
    %1 = vector.shape_cast %0 : vector<1x8x256xf32> to vector<8x256xf32>
    %c0_2 = arith.constant 0 : index
    %c0_3 = arith.constant 0 : index
    %2 = vector.load %arg3[%c0_2, %c0_3] : memref<8x1xf32, #tpu.memory_space<vmem>>, vector<8x1xf32>
    %3 = vector.broadcast %2 : vector<8x1xf32> to vector<8x256xf32>
    %4 = arith.mulf %1, %3 : vector<8x256xf32>
    %c0_4 = arith.constant 0 : index
    %c0_5 = arith.constant 0 : index
    %5 = vector.load %arg4[%c0_4, %c0_5] : memref<8x1xf32, #tpu.memory_space<vmem>>, vector<8x1xf32>
    %6 = vector.broadcast %5 : vector<8x1xf32> to vector<8x256xf32>
    %7 = arith.addf %4, %6 : vector<8x256xf32>
    %cst = arith.constant 0.000000e+00 : f32
    %8 = vector.broadcast %cst : f32 to vector<8x256xf32>
    %9 = arith.maximumf %7, %8 : vector<8x256xf32>
    %c0_6 = arith.constant 0 : index
    %c0_7 = arith.constant 0 : index
    %10 = vector.load %arg5[%c0_6, %c0_7] : memref<32x8xf32, #tpu.memory_space<vmem>>, vector<32x8xf32>
    %cst_8 = arith.constant dense<0.000000e+00> : vector<32x256xf32>
    %11 = tpu.matmul %10, %9, %cst_8 {dimension_numbers = #tpu.dot_dimension_numbers<[1], [0], [0], [1], [0, 0, 1, 1], [], []>} : vector<32x8xf32>, vector<8x256xf32>, vector<32x256xf32> -> vector<32x256xf32>
    %c0_9 = arith.constant 0 : index
    %c0_10 = arith.constant 0 : index
    %12 = vector.load %arg6[%c0_9, %c0_10] : memref<32x1xf32, #tpu.memory_space<vmem>>, vector<32x1xf32>
    %13 = vector.broadcast %12 : vector<32x1xf32> to vector<32x256xf32>
    %14 = arith.addf %11, %13 : vector<32x256xf32>
    %cst_11 = arith.constant 0.000000e+00 : f32
    %15 = vector.broadcast %cst_11 : f32 to vector<32x256xf32>
    %16 = arith.maximumf %14, %15 : vector<32x256xf32>
    %c0_i32 = arith.constant 0 : i32
    %17 = arith.cmpi sgt, %arg1, %c0_i32 : i32
    %18 = arith.extui %17 : i1 to i32
    %c0_i32_12 = arith.constant 0 : i32
    %19 = arith.cmpi ne, %18, %c0_i32_12 : i32
    scf.if %19 {
      %c0_21 = arith.constant 0 : index
      %c0_22 = arith.constant 0 : index
      %28 = vector.load %arg10[%c0_21, %c0_22] : memref<32x256xf32, #tpu.memory_space<vmem>>, vector<32x256xf32>
      %c0_23 = arith.constant 0 : index
      %c0_24 = arith.constant 0 : index
      %29 = vector.load %arg11[%c0_23, %c0_24] : memref<32x1xf32, #tpu.memory_space<vmem>>, vector<32x1xf32>
      %c4_i32 = arith.constant 4 : i32
      %30 = arith.cmpi slt, %arg1, %c4_i32 : i32
      %31 = arith.extui %30 : i1 to i32
      %32 = arith.sitofp %31 : i32 to f32
      %33 = vector.extract_strided_slice %16 {offsets = [0, 0], sizes = [32, 1], strides = [1, 1]} : vector<32x256xf32> to vector<32x1xf32>
      %34 = vector.broadcast %32 : f32 to vector<32x1xf32>
      %35 = arith.mulf %33, %34 : vector<32x1xf32>
      %36 = tpu.concatenate %29, %28, %35 in 1 : vector<32x1xf32>, vector<32x256xf32>, vector<32x1xf32> -> vector<32x258xf32>
      %37 = vector.extract_strided_slice %36 {offsets = [0, 0], sizes = [32, 256], strides = [1, 1]} : vector<32x258xf32> to vector<32x256xf32>
      %38 = vector.extract_strided_slice %36 {offsets = [0, 1], sizes = [32, 256], strides = [1, 1]} : vector<32x258xf32> to vector<32x256xf32>
      %39 = vector.extract_strided_slice %36 {offsets = [0, 2], sizes = [32, 256], strides = [1, 1]} : vector<32x258xf32> to vector<32x256xf32>
      %40 = tpu.concatenate %37, %38, %39 in 0 : vector<32x256xf32>, vector<32x256xf32>, vector<32x256xf32> -> vector<96x256xf32>
      %c0_25 = arith.constant 0 : index
      %c0_26 = arith.constant 0 : index
      %41 = vector.load %arg7[%c0_25, %c0_26] : memref<8x96xf32, #tpu.memory_space<vmem>>, vector<8x96xf32>
      %cst_27 = arith.constant dense<0.000000e+00> : vector<8x256xf32>
      %42 = tpu.matmul %41, %40, %cst_27 {dimension_numbers = #tpu.dot_dimension_numbers<[1], [0], [0], [1], [0, 0, 1, 1], [], []>} : vector<8x96xf32>, vector<96x256xf32>, vector<8x256xf32> -> vector<8x256xf32>
      %c0_28 = arith.constant 0 : index
      %c0_29 = arith.constant 0 : index
      %43 = vector.load %arg9[%c0_28, %c0_29] : memref<8x256xf32, #tpu.memory_space<vmem>>, vector<8x256xf32>
      %c0_30 = arith.constant 0 : index
      %c0_31 = arith.constant 0 : index
      %c0_32 = arith.constant 0 : index
      %44 = vector.load %arg8[%c0_30, %c0_31, %c0_32] : memref<1x16x256xf32, #tpu.memory_space<vmem>>, vector<1x8x256xf32>
      %45 = vector.shape_cast %44 : vector<1x8x256xf32> to vector<8x256xf32>
      %46 = vector.shape_cast %43 : vector<8x256xf32> to vector<1x8x256xf32>
      tpu.vector_store %arg8[%c0_30, %c0_31, %c0_32], %46 {strides = array<i32>} : memref<1x16x256xf32, #tpu.memory_space<vmem>>, vector<1x8x256xf32>,
      %c0_33 = arith.constant 0 : index
      %c8 = arith.constant 8 : index
      %c0_34 = arith.constant 0 : index
      %47 = vector.load %arg8[%c0_33, %c8, %c0_34] : memref<1x16x256xf32, #tpu.memory_space<vmem>>, vector<1x8x256xf32>
      %48 = vector.shape_cast %47 : vector<1x8x256xf32> to vector<8x256xf32>
      %49 = vector.shape_cast %42 : vector<8x256xf32> to vector<1x8x256xf32>
      tpu.vector_store %arg8[%c0_33, %c8, %c0_34], %49 {strides = array<i32>} : memref<1x16x256xf32, #tpu.memory_space<vmem>>, vector<1x8x256xf32>,
    } else {
    }
    %c0_i32_13 = arith.constant 0 : i32
    %20 = arith.cmpi eq, %arg1, %c0_i32_13 : i32
    %21 = arith.extui %20 : i1 to i32
    %c0_i32_14 = arith.constant 0 : i32
    %22 = arith.cmpi ne, %21, %c0_i32_14 : i32
    scf.if %22 {
      %cst_21 = arith.constant 0.000000e+00 : f32
      %28 = vector.broadcast %cst_21 : f32 to vector<32x1xf32>
      %c0_22 = arith.constant 0 : index
      %c0_23 = arith.constant 0 : index
      %29 = vector.load %arg11[%c0_22, %c0_23] : memref<32x1xf32, #tpu.memory_space<vmem>>, vector<32x1xf32>
      tpu.vector_store %arg11[%c0_22, %c0_23], %28 {strides = array<i32>} : memref<32x1xf32, #tpu.memory_space<vmem>>, vector<32x1xf32>,
    } else {
    }
    %c0_i32_15 = arith.constant 0 : i32
    %23 = arith.cmpi sgt, %arg1, %c0_i32_15 : i32
    %24 = arith.extui %23 : i1 to i32
    %c0_i32_16 = arith.constant 0 : i32
    %25 = arith.cmpi ne, %24, %c0_i32_16 : i32
    scf.if %25 {
      %c0_21 = arith.constant 0 : index
      %c255 = arith.constant 255 : index
      %28 = vector.load %arg10[%c0_21, %c255] : memref<32x256xf32, #tpu.memory_space<vmem>>, vector<32x1xf32>
      %c0_22 = arith.constant 0 : index
      %c0_23 = arith.constant 0 : index
      %29 = vector.load %arg11[%c0_22, %c0_23] : memref<32x1xf32, #tpu.memory_space<vmem>>, vector<32x1xf32>
      tpu.vector_store %arg11[%c0_22, %c0_23], %28 {strides = array<i32>} : memref<32x1xf32, #tpu.memory_space<vmem>>, vector<32x1xf32>,
    } else {
    }
    %c0_17 = arith.constant 0 : index
    %c0_18 = arith.constant 0 : index
    %26 = vector.load %arg10[%c0_17, %c0_18] : memref<32x256xf32, #tpu.memory_space<vmem>>, vector<32x256xf32>
    tpu.vector_store %arg10[%c0_17, %c0_18], %16 {strides = array<i32>} : memref<32x256xf32, #tpu.memory_space<vmem>>, vector<32x256xf32>,
    %c0_19 = arith.constant 0 : index
    %c0_20 = arith.constant 0 : index
    %27 = vector.load %arg9[%c0_19, %c0_20] : memref<8x256xf32, #tpu.memory_space<vmem>>, vector<8x256xf32>
    tpu.vector_store %arg9[%c0_19, %c0_20], %1 {strides = array<i32>} : memref<8x256xf32, #tpu.memory_space<vmem>>, vector<8x256xf32>,
    return
  }
  func.func @transform_0(%arg0: i32, %arg1: i32) -> (i32, i32, i32) {
    %c3_i32 = arith.constant 3 : i32
    %0 = arith.minsi %arg1, %c3_i32 : i32
    %c0_i32 = arith.constant 0 : i32
    %c0_i32_0 = arith.constant 0 : i32
    return %arg0, %c0_i32, %0 : i32, i32, i32
  }
  func.func @transform_1(%arg0: i32, %arg1: i32) -> (i32, i32) {
    %c0_i32 = arith.constant 0 : i32
    %c0_i32_0 = arith.constant 0 : i32
    %c0_i32_1 = arith.constant 0 : i32
    return %c0_i32, %c0_i32_0 : i32, i32
  }
  func.func @transform_2(%arg0: i32, %arg1: i32) -> (i32, i32) {
    %c0_i32 = arith.constant 0 : i32
    %c0_i32_0 = arith.constant 0 : i32
    %c0_i32_1 = arith.constant 0 : i32
    return %c0_i32, %c0_i32_0 : i32, i32
  }
  func.func @transform_3(%arg0: i32, %arg1: i32) -> (i32, i32) {
    %c0_i32 = arith.constant 0 : i32
    %c0_i32_0 = arith.constant 0 : i32
    %c0_i32_1 = arith.constant 0 : i32
    return %c0_i32, %c0_i32_0 : i32, i32
  }
  func.func @transform_4(%arg0: i32, %arg1: i32) -> (i32, i32) {
    %c0_i32 = arith.constant 0 : i32
    %c0_i32_0 = arith.constant 0 : i32
    %c0_i32_1 = arith.constant 0 : i32
    return %c0_i32, %c0_i32_0 : i32, i32
  }
  func.func @transform_5(%arg0: i32, %arg1: i32) -> (i32, i32) {
    %c0_i32 = arith.constant 0 : i32
    %c0_i32_0 = arith.constant 0 : i32
    %c0_i32_1 = arith.constant 0 : i32
    return %c0_i32, %c0_i32_0 : i32, i32
  }
  func.func @transform_6(%arg0: i32, %arg1: i32) -> (i32, i32, i32) {
    %c1_i32 = arith.constant 1 : i32
    %0 = arith.subi %arg1, %c1_i32 : i32
    %c0_i32 = arith.constant 0 : i32
    %1 = arith.maxsi %0, %c0_i32 : i32
    %c0_i32_0 = arith.constant 0 : i32
    %c0_i32_1 = arith.constant 0 : i32
    return %arg0, %c0_i32_0, %1 : i32, i32, i32
  }
}

</mosaic_0001>

<bundles_post_ra>
// kernel: tpu_custom_call.1
= control target key start
LH: loop header
LB: loop body
LE: loop exit
PB: predicated region body
PF: predicated region fallthrough
CT: control target
= control target key end

     0   :  { %s1625_s0 = inlined_call_operand.hbm [shape: f32[2,8,1024], index: 0, kind: input, shape index: {}]   ;;  %s1626_s1 = inlined_call_operand.vmem [shape: f32[8,1], index: 1, kind: input, shape index: {}]   ;;  %s1627_s2 = inlined_call_operand.vmem [shape: f32[8,1], index: 2, kind: input, shape index: {}]   ;;  %s1628_s3 = inlined_call_operand.vmem [shape: f32[32,8], index: 3, kind: input, shape index: {}]   ;;  %s1629_s4 = inlined_call_operand.vmem [shape: f32[32,1], index: 4, kind: input, shape index: {}]   ;;  %s1630_s5 = inlined_call_operand.vmem [shape: f32[8,96], index: 5, kind: input, shape index: {}]   ;;  %s1631_s6 = inlined_call_operand.hbm [shape: f32[2,16,1024], index: 6, kind: output, shape index: {}]  }
   0x1   :  { %1640 = sst [smem:[#allocation18_spill]] %s1631_s6 }
   0x2   :  { %11 = vsyncpa [#allocation6], 0 }
   0x3   :  { %13 = vsyncpa [#allocation6 + $0x1], 0 }
   0x4   :  { %14 = vsyncpa [#allocation7], 0 }
   0x5   :  { %16 = vsyncpa [#allocation7 + $0x1], 0  ;;  %s1223_s21 = smov 0   ;;  %s1225_s22 = smov 0  }
   0x6   :  { %s1227_s23 = smov 0   ;;  %s1229_s24 = smov 0  }
   0x7   :  { %s1231_s25 = smov 0   ;;  %s1233_s26 = smov 0  }
   0x8   :  { %s1235_s27 = smov 0   ;;  %s1237_s28 = smov 0  }
   0x9   :  { %s1239_s29 = smov 0   ;;  %s1241_s30 = smov 0  }
   0xa   :  { %s1243_s7 = smov 0  }
   0xb LB: > { %1641 = sst [smem:[#allocation11_spill]] %s1133_s21  ;;  %s880_s8 = sadd.s32 4294967295, %s1173_s7   ;;  %s1173_s7 = sphi %s1243_s7, %s22_s7   ;;  %s1169_s30 = sphi %s1241_s30, %s1670_s30   ;;  %s1165_s29 = sphi %s1239_s29, %s1669_s29   ;;  %s1161_s28 = sphi %s1237_s28, %s1668_s28   ;;  %s1157_s27 = sphi %s1235_s27, %s1660_s27   ;;  %s1153_s26 = sphi %s1233_s26, %s1659_s26   ;;  %s1149_s25 = sphi %s1231_s25, %s1667_s25   ;;  %s1145_s24 = sphi %s1229_s24, %s1666_s24   ;;  %s1141_s23 = sphi %s1227_s23, %s1665_s23   ;;  %s1137_s22 = sphi %s1225_s22, %s1664_s22   ;;  %s1133_s21 = sphi %s1223_s21, %s1663_s21  }
   0xc   : > { %1642 = sst [smem:[#allocation12_spill]] %s1153_s26  ;;  %s31_s10 = sadd.s32 1, %s1165_s29 }
   0xd   : > { %1643 = sst [smem:[#allocation13_spill]] %s1165_s29  ;;  %s34_s11 = sadd.s32 1, %s1169_s30 }
   0xe   : > { %p32_p0 = scmp.ge.s32.totalorder %s31_s10, 5  ;;  %p38_p1 = scmp.lt.s32.totalorder %s1165_s29, 3 }
   0xf   : > { %s47_s12 = sadd.s32 1, %s1153_s26  ;;  %p54_p2 = scmp.ne.s32.totalorder %s1153_s26, %s1149_s25 }
  0x10   : > { %s1672_s10 = smov (%p32_p0, %s31_s10), 0  ;;  %s1674_s11 = smov (!%p32_p0, %s34_s11), %s1169_s30 }
  0x11   : > { %1644 = sst [smem:[#allocation14_spill]] %s1672_s10  ;;  %p36_p3 = scmp.ge.s32.totalorder %s1674_s11, 2 }
  0x12   : > { %s1290_s13 = scalar_select %p38_p1, %s1165_s29, 3 }
  0x13   : > { %p40_p4 = scmp.lt.s32.totalorder %s1672_s10, 3  ;;  %p55_p5 = scmp.eq.s32.totalorder %s1173_s7, 0 }
  0x14   : > { %p60_p6 = scmp.ne.s32.totalorder %s1149_s25, %s1145_s24  ;;  %s1676_s11 = smov (%p36_p3, %s1674_s11), 0 }
  0x15   : > { %1645 = sst [smem:[#allocation15_spill]] %s1676_s11  ;;  %s42_s15 = ssub.s32 %s1169_s30, %s1676_s11 }
  0x16   : > { %s41_s14 = scalar_select %p40_p4, %s1672_s10, 3 }
  0x17   : > { %p1301_p7 = por %p55_p5, %p54_p2  ;;  %p61_p8 = scmp.eq.s32.totalorder %s880_s8, 0 }
  0x18   : > { %s43_s17 = ssub.s32 %s1290_s13, %s41_s14  ;;  %s882_s19 = sadd.s32 4294967295, %s1165_s29 }
  0x19   : > { %s44_s18 = sor.u32 %s43_s17, %s42_s15  ;;  %p1309_p10 = por %p61_p8, %p60_p6 }
  0x1a   : > { %p45_p9 = scmp.eq.s32.totalorder %s44_s18, 0  ;;  %p176_p11 = scmp.gt.s32.totalorder %s882_s19, 0 }
  0x1b   : > { %s883_s24 = sadd.s32 4294967295, %s1672_s10  ;;  %s186_s14 = sadd.s32 1, %s1141_s23 }
  0x1c   : > { %s1315_s9 = scalar_select %p45_p9, %s1153_s26, %s47_s12  }
  0x1d   : > { %s1678_s19 = smov (!%p176_p11, %s882_s19), 0  ;;  %p179_p12 = scmp.gt.s32.totalorder %s883_s24, 0 }
  0x1e   : > { %1648 = sst [smem:[#allocation16_spill]] %s1315_s9  ;;  %p196_p13 = scmp.ne.s32.totalorder %s1141_s23, %s1137_s22 }
  0x1f   : > { %p197_p0 = scmp.eq.s32.totalorder %s880_s8, 9  ;;  %s1680_s24 = smov (!%p179_p12, %s883_s24), 0 }
  0x20   : > { %p202_p2 = scmp.ne.s32.totalorder %s1137_s22, %s1133_s21  ;;  %s182_s18 = ssub.s32 %s1678_s19, %s1680_s24 }
  0x21   : > { %p1322_p1 = por %p197_p0, %p196_p13  ;;  %s1651_s11 = sadd.s32 4294967294, %s1173_s7  }
  0x22   : > { %p203_p3 = scmp.eq.s32.totalorder %s1651_s11, 9  ;;  %s183_s12 = sor.u32 %s182_s18, %s42_s15 }
  0x23   : > { %s1649_s17 = scalar_select %p1322_p1, 1, 0 }
  0x24   : > { %p184_p4 = scmp.eq.s32.totalorder %s183_s12, 0  ;;  %p1330_p5 = por %p203_p3, %p202_p2 }
  0x25   : > { %1650 = sst [smem:[#allocation17_spill]] %s1649_s17  ;;  %p922_p6 = scmp.lt.s32.totalorder %s1173_s7, 10 }
  0x26   : > { %s1652_s10 = scalar_select %p1330_p5, 1, 0 }
  0x27   : > { %s238_s8 = sand.u32 1, %s1153_s26   ;;  %s887_s6 = sshll.u32 %s1290_s13, 1 }
  0x28   : > { %s1337_s29 = scalar_select %p184_p4, %s1141_s23, %s186_s14  }
  0x29   : > { %s886_s9 = sshll.u32 %s238_s8, 4  ;;  %s888_s17 = sshll.u32 %s1169_s30, 3 }
  0x2a   : > { %s242_s21 = scalar_lea.vmem [#allocation5], %s886_s9  ;;  %s250_s24 = sadd.s32 %s888_s17, %s887_s6 }
  0x2b   : > { %s254_s19 = sshll.u32 %s242_s21, 4  ;;  %s889_s11 = sshll.u32 %s250_s24, 7  ;;  %s255_s19 = int_to_ptr.vmem [resolvable:$true] %s254_s19 }
  0x2c   : > { %p1343_p8 = pnand %p922_p6, %p1301_p7  ;;  %s252_s26 = scalar_lea.hbm %s1625_s0, %s889_s11 }
  0x2d   : > { %p890_p9 = scmp.ge.s32.totalorder %s1173_s7, 1  ;;  %p259_p11 = scmp.lt.s32.totalorder %s1173_s7, 11 }
  0x2e   : > { %s239_s14 = scalar_lea.sflag [#allocation6], %s238_s8  ;;  %p1027_p12 = pneg %p1343_p8 }
  0x2f   : > { %s1038_s9 = scalar_lea.vmem %s255_s19, 256  ;;  %s1175_s6 = smov [#allocation5]  }
  0x30   : > { %p1039_p13 = scmp.ne.s32.totalorder %s255_s19, %s1038_s9  ;;  %s1043_s21 = sshll.u32 %s1175_s6, 4  ;;  %s1044_s21 = int_to_ptr.vmem [resolvable:$false] %s1043_s21 }
  0x31   : > { %s1045_s13 = scalar_lea.vmem %s1044_s21, 512  ;;  %p1046_p7 = scmp.lt.s32.totalorder %s255_s19, %s1044_s21 }
  0x32   : > { %p1041_p0 = pnand %p1039_p13, %p1027_p12  ;;  %p1047_p3 = scmp.lt.s32.totalorder %s1045_s13, %s1038_s9 }
  0x34   : > { %p1042_p2 = pneg %p1041_p0  ;;  %p1048_p4 = por %p1047_p3, %p1046_p7 }
  0x36   : > { %p1049_p6 = pnand %p1048_p4, %p1042_p2 }
  0x38   : > { %1052 = shalt.err (!%p1049_p6)
}
  0x39   : > { %917 = dma.hbm_to_vmem [thread:$0]  (!%p1343_p8), %s252_s26, 256, %s255_s19, %s239_s14  }
  0x3a   : > { %p260_p5 = pnand %p890_p9, %p259_p11 }
  0x3b   : > { %s265_s16 = sand.u32 (!%p260_p5), 1, %s1149_s25  }
  0x3c   : > { %263 = sbr.rel (%p260_p5) target bundleno = 1064 (0x428), region = 44  ;;  %s891_s17 = sshll.u32 (!%p260_p5), %s265_s16, 4 }
  0x3d   : > { %s266_s8 = scalar_lea.sflag (!%p260_p5), [#allocation6], %s265_s16  ;;  %s269_s24 = scalar_lea.vmem (!%p260_p5), [#allocation5], %s891_s17 }
  0x41   : > { %1124 = dma.done.wait (%p1309_p10), %s266_s8, 256  }
  0x42   : > { %1126 = vsyncadd (%p1309_p10), %s266_s8, 4294967040  ;;  %v1176_v0 = vmov 0   ;;  %v307_v1 = vld [vmem:[%s1626_s1] sm:$0xff]  ;;  %s295_s18 = sand.u32 1, %s1137_s22   ;;  %v331_v3 = vld [vmem:[%s1629_s4 + $0x10] sm:$0xff]  ;;  %v1177_v4 = vmov 0.0  }
  0x43   : > { %1023 = vset.pattern.permute.xlu0 %v1176_v0  ;;  %1024 = vset.pattern.permute.xlu1 %v1176_v0  ;;  %v315_v2 = vld [vmem:[%s1627_s2] sm:$0xff]  ;;  %s1374_s12 = sshll.u32 %s295_s18, 5  ;;  %v330_v6 = vld [vmem:[%s1629_s4 + $0x8] sm:$0xff]  ;;  %v332_v7 = vld [vmem:[%s1629_s4 + $0x18] sm:$0xff]  ;;  %vm353_vm0 = vcmask 64512   ;;  %p897_p10 = scmp.le.s32.totalorder %s1157_s27, 0 }
  0x44   : > { %310 = vperm.xlu0 %1023, %v307_v1   ;;  %430 = vmatprep.mubr.f32.mxu0 %v1177_v4  ;;  %v329_v5 = vld [vmem:[%s1629_s4] sm:$0xff]  ;;  %v1390_v10 = vld [vmem:[%s269_s24 + $0x8] sm:$0xff]  ;;  %v327_v19 = vld [vmem:[%s1628_s3 + $0x10] sm:$0xff]  ;;  %s1431_s9 = scalar_lea.vmem [#allocation8], %s1374_s12  ;;  %p479_p5 = scmp.lt.s32.totalorder (!%p897_p10), %s1157_s27, 4 }
  0x45   : > { %442 = vmatprep.mubr.f32.mxu1 %v1177_v4  ;;  %335 = vperm.xlu1 %1024, %v329_v5   ;;  %v1388_v9 = vld [vmem:[%s269_s24] sm:$0xff]  ;;  %v326_v20 = vld [vmem:[%s1628_s3 + $0x8] sm:$0xff]  ;;  %v328_v21 = vld [vmem:[%s1628_s3 + $0x18] sm:$0xff]  ;;  %s1178_s6 = smov (!%p897_p10), 1   ;;  %s1179_s12 = smov (!%p897_p10), 126  }
  0x46   : > { %v325_v18 = vld [vmem:[%s1628_s3] sm:$0xff]  ;;  %s1180_s16 = smov (!%p897_p10), 127  }
  0x48   : > { %318 = vperm.xlu0 %1023, %v315_v2  }
  0x49   : > { %340 = vperm.xlu1 %1024, %v330_v6  }
  0x4c   : > { %345 = vperm.xlu0 %1023, %v331_v3  }
  0x4d   : > { %350 = vperm.xlu1 %1024, %v332_v7  }
  0xbf   : > { %v311_v8 = vpop.permute.xlu0 %310 }
  0xc0   : > { %v313_v11 = vmul.f32 %v311_v8, %v1388_v9  ;;  %v314_v12 = vmul.f32 %v311_v8, %v1390_v10  ;;  %v336_v22 = vpop.permute.xlu1 %335 }
  0xc3   : > { %v319_v13 = vpop.permute.xlu0 %318 }
  0xc4   : > { %v321_v14 = vadd.f32 %v319_v13, %v313_v11  ;;  %v322_v15 = vadd.f32 %v319_v13, %v314_v12  ;;  %v341_v23 = vpop.permute.xlu1 %340 }
  0xc6   : > { %v324_v16 = vmax.f32 %v322_v15, 0.0  ;;  %v323_v17 = vmax.f32 %v321_v14, 0.0 }
  0xc7   : > { %v346_v24 = vpop.permute.xlu0 %345 }
  0xc8   : > { %396 = vmatprep.subr.mxu0 %v324_v16  ;;  %908 = vmatprep.subr.mxu1 %v324_v16  ;;  %v351_v31 = vpop.permute.xlu1 %350 }
  0xc9   : > { %397 = vmatpush1.msra.mxu0 %v323_v17  ;;  %909 = vmatpush1.msra.mxu1 %v323_v17 }
  0xca   : > { %893 = vmatmul.mubr.msk.f32.vlgmr.msra.gmra.mxu0 %vm353_vm0, %v325_v18  ;;  %895 = vmatmul.mubr.msk.f32.vlgmr.msra.gmra.mxu1 %vm353_vm0, %v327_v19 }
  0xcb   : > { %436 = vmatprep.mubr.f32.mxu0 %v1177_v4  ;;  %448 = vmatprep.mubr.f32.mxu1 %v1177_v4 }
  0xce   : > { %894 = vmatmul.mubr.msk.f32.gmra.mxu0 %vm353_vm0, %v326_v20  ;;  %896 = vmatmul.mubr.msk.f32.gmra.mxu1 %vm353_vm0, %v328_v21 }
 0x18a   : > { %v432_v25 = vpop.f32.mrf.mxu0  ;;  %v444_v26 = vpop.f32.mrf.mxu1 }
 0x18b   : > { %v1406_v27 = vadd.f32 %v432_v25, %v336_v22  ;;  %v1408_v28 = vadd.f32 %v444_v26, %v346_v24 }
 0x18c   : > { %v434_v29 = vpop.f32.mrf.mxu0  ;;  %v446_v30 = vpop.f32.mrf.mxu1 }
 0x18d   : > { %v455_v32 = vmax.f32 %v1406_v27, 0.0  ;;  %v459_v33 = vmax.f32 %v1408_v28, 0.0  ;;  %v1412_v34 = vadd.f32 %v434_v29, %v336_v22  ;;  %v1414_v35 = vadd.f32 %v446_v30, %v346_v24 }
 0x18e   : > { %v438_v36 = vpop.f32.mrf.mxu0  ;;  %v450_v37 = vpop.f32.mrf.mxu1 }
 0x18f   : > { %v456_v38 = vmax.f32 %v1412_v34, 0.0  ;;  %v460_v39 = vmax.f32 %v1414_v35, 0.0  ;;  %v1418_v40 = vadd.f32 %v438_v36, %v341_v23  ;;  %v1420_v41 = vadd.f32 %v450_v37, %v351_v31  ;;  %466 = sbr.rel (%p897_p10) target bundleno = 898 (0x382), region = 52 }
 0x190   : > { %v440_v42 = vpop.f32.mrf.mxu0  ;;  %v452_v43 = vpop.f32.mrf.mxu1 }
 0x191   : > { %v457_v44 = vmax.f32 %v1418_v40, 0.0  ;;  %v461_v45 = vmax.f32 %v1420_v41, 0.0  ;;  %v1424_v46 = vadd.f32 %v440_v42, %v341_v23  ;;  %v1426_v47 = vadd.f32 %v452_v43, %v351_v31 }
 0x193   : > { %v458_v48 = vmax.f32 %v1424_v46, 0.0  ;;  %v462_v49 = vmax.f32 %v1426_v47, 0.0 }
 0x194   : > { %v473_v50 = vld [vmem:[#allocation3 + $0x30] sm:$0xff]  ;;  %v471_v51 = vld [vmem:[#allocation3 + $0x20] sm:$0xff]  ;;  %s480_s21 = scalar_select %p479_p5, 1, 0  ;;  %v472_v53 = vld [vmem:[#allocation3 + $0x38] sm:$0xff]  ;;  %vm511_vm1 = vcmask 7168  }
 0x195   : > { %507 = vrot.lane.b32.xlu0 %v473_v50, %s1178_s6  ;;  %503 = vrot.lane.b32.xlu1 %v471_v51, %s1178_s6  ;;  %v474_v52 = vld [vmem:[#allocation3] sm:$0xff]  ;;  %v469_v57 = vld [vmem:[#allocation3 + $0x8] sm:$0xff]  ;;  %v470_v59 = vld [vmem:[#allocation3 + $0x18] sm:$0xff]  ;;  %v1181_v31 = vmov 0.0   ;;  %vm625_vm2 = vcmask 1031168   ;;  %vm584_vm3 = vcmask 1039360  }
 0x196   : > { %s481_s13 = scvt.s32.f32 %s480_s21  ;;  %v468_v60 = vld [vmem:[#allocation3 + $0x10] sm:$0xff]  ;;  %v467_v61 = vld [vmem:[#allocation3 + $0x28] sm:$0xff]  ;;  %v478_v3 = vld [vmem:[#allocation4 + $0x18] sm:$0xff]  ;;  %711 = vmatprep.mubr.f32.mxu0 %v1181_v31  ;;  %vm643_vm4 = vcmask 785408  }
 0x197   : > { %v477_v8 = vld [vmem:[#allocation4 + $0x10] sm:$0xff]  ;;  %v476_v17 = vld [vmem:[#allocation4 + $0x8] sm:$0xff]  ;;  %v475_v22 = vld [vmem:[#allocation4] sm:$0xff] }
 0x198   : > { %v482_v54 = vstv %s481_s13 }
 0x199   : > { %509 = vrot.lane.b32.xlu0 %v474_v52, %s1178_s6  ;;  %v486_v55 = vmul.f32 %v482_v54, %v461_v45  ;;  %v485_v56 = vmul.f32 %v482_v54, %v459_v33  ;;  %v484_v58 = vmul.f32 %v482_v54, %v457_v44  ;;  %v483_v62 = vmul.f32 %v482_v54, %v455_v32 }
 0x19b   : > { %538 = vrot.lane.b32.xlu1 %v486_v55, %s1178_s6 }
 0x19d   : > { %505 = vrot.lane.b32.xlu0 %v472_v53, %s1178_s6 }
 0x19f   : > { %536 = vrot.lane.b32.xlu1 %v485_v56, %s1178_s6 }
 0x1a1   : > { %499 = vrot.lane.b32.xlu0 %v469_v57, %s1178_s6 }
 0x1a3   : > { %501 = vrot.lane.b32.xlu1 %v470_v59, %s1178_s6 }
 0x1a5   : > { %534 = vrot.lane.b32.xlu0 %v484_v58, %s1178_s6 }
 0x1a7   : > { %495 = vrot.lane.b32.xlu1 %v467_v61, %s1178_s6 }
 0x1a9   : > { %497 = vrot.lane.b32.xlu0 %v468_v60, %s1178_s6 }
 0x1ab   : > { %532 = vrot.lane.b32.xlu1 %v483_v62, %s1178_s6 }
 0x207   : > { %v508_v63 = vpop.permute.xlu0 %507  ;;  %v504_v0 = vpop.permute.xlu1 %503 }
 0x208   : > { %v1451_v6 = vsel %vm511_vm1, %v478_v3, %v508_v63  ;;  %v1461_v13 = vsel %vm511_vm1, %v477_v8, %v504_v0 }
 0x20b   : > { %v510_v1 = vpop.permute.xlu0 %509 }
 0x20c   : > { %v1446_v2 = vsel %vm511_vm1, %v508_v63, %v510_v1 }
 0x20d   : > { %621 = vrot.lane.b32.xlu0 %v1446_v2, %s1179_s12  ;;  %v539_v5 = vpop.permute.xlu1 %538 }
 0x20e   : > { %v551_v25 = vsel %vm511_vm1, %v510_v1, %v539_v5 }
 0x20f   : > { %v506_v4 = vpop.permute.xlu0 %505 }
 0x210   : > { %v1454_v7 = vsel %vm511_vm1, %v504_v0, %v506_v4 }
 0x211   : > { %619 = vrot.lane.b32.xlu0 %v1451_v6, %s1179_s12  ;;  %615 = vrot.lane.b32.xlu1 %v1454_v7, %s1179_s12  ;;  %v537_v11 = vpop.permute.xlu1 %536 }
 0x212   : > { %v550_v24 = vsel %vm511_vm1, %v506_v4, %v537_v11 }
 0x213   : > { %v500_v12 = vpop.permute.xlu0 %499 }
 0x214   : > { %v1471_v20 = vsel %vm511_vm1, %v476_v17, %v500_v12 }
 0x215   : > { %613 = vrot.lane.b32.xlu1 %v1461_v13, %s1179_s12  ;;  %v502_v14 = vpop.permute.xlu1 %501 }
 0x216   : > { %v1466_v16 = vsel %vm511_vm1, %v500_v12, %v502_v14 }
 0x217   : > { %v535_v15 = vpop.permute.xlu0 %534  ;;  %609 = vrot.lane.b32.xlu0 %v1466_v16, %s1179_s12 }
 0x218   : > { %v549_v29 = vsel %vm511_vm1, %v502_v14, %v535_v15 }
 0x219   : > { %v496_v19 = vpop.permute.xlu1 %495 }
 0x21a   : > { %v1481_v23 = vsel %vm511_vm1, %v475_v22, %v496_v19 }
 0x21b   : > { %v498_v18 = vpop.permute.xlu0 %497  ;;  %607 = vrot.lane.b32.xlu0 %v1471_v20, %s1179_s12 }
 0x21c   : > { %v1474_v21 = vsel %vm511_vm1, %v496_v19, %v498_v18 }
 0x21d   : > { %603 = vrot.lane.b32.xlu1 %v1474_v21, %s1179_s12  ;;  %v533_v26 = vpop.permute.xlu1 %532 }
 0x21e   : > { %v548_v30 = vsel %vm511_vm1, %v498_v18, %v533_v26 }
 0x21f   : > { %580 = vrot.lane.b32.xlu0 %v1446_v2, %s1180_s16 }
 0x221   : > { %601 = vrot.lane.b32.xlu1 %v1481_v23, %s1179_s12 }
 0x223   : > { %578 = vrot.lane.b32.xlu0 %v1451_v6, %s1180_s16 }
 0x225   : > { %574 = vrot.lane.b32.xlu1 %v1454_v7, %s1180_s16 }
 0x227   : > { %568 = vrot.lane.b32.xlu0 %v1466_v16, %s1180_s16 }
 0x229   : > { %572 = vrot.lane.b32.xlu1 %v1461_v13, %s1180_s16 }
 0x22b   : > { %566 = vrot.lane.b32.xlu0 %v1471_v20, %s1180_s16 }
 0x22d   : > { %562 = vrot.lane.b32.xlu1 %v1474_v21, %s1180_s16 }
 0x22f   : > { %617 = vrot.lane.b32.xlu0 %v550_v24, %s1179_s12 }
 0x231   : > { %623 = vrot.lane.b32.xlu1 %v551_v25, %s1179_s12 }
 0x233   : > { %605 = vrot.lane.b32.xlu0 %v548_v30, %s1179_s12 }
 0x235   : > { %611 = vrot.lane.b32.xlu1 %v549_v29, %s1179_s12 }
 0x237   : > { %576 = vrot.lane.b32.xlu0 %v550_v24, %s1180_s16 }
 0x239   : > { %582 = vrot.lane.b32.xlu1 %v551_v25, %s1180_s16 }
 0x23b   : > { %564 = vrot.lane.b32.xlu0 %v548_v30, %s1180_s16 }
 0x23d   : > { %570 = vrot.lane.b32.xlu1 %v549_v29, %s1180_s16 }
 0x241   : > { %560 = vrot.lane.b32.xlu1 %v1481_v23, %s1180_s16 }
 0x27f   : > { %v622_v36 = vpop.permute.xlu0 %621 }
 0x283   : > { %v616_v37 = vpop.permute.xlu1 %615  ;;  %v620_v42 = vpop.permute.xlu0 %619 }
 0x284   : > { %v632_v0 = vsel %vm625_vm2, %v620_v42, %v622_v36  ;;  %v642_v42 = vld [vmem:[%s1630_s5] sm:$0xff] }
 0x287   : > { %v614_v43 = vpop.permute.xlu1 %613 }
 0x288   : > { %v630_v5 = vsel %vm625_vm2, %v614_v43, %v616_v37 }
 0x289   : > { %v610_v50 = vpop.permute.xlu0 %609 }
 0x28d   : > { %v608_v51 = vpop.permute.xlu0 %607 }
 0x28e   : > { %v628_v11 = vsel %vm625_vm2, %v608_v51, %v610_v50 }
 0x28f   : > { %v604_v52 = vpop.permute.xlu1 %603 }
 0x291   : > { %v581_v53 = vpop.permute.xlu0 %580 }
 0x293   : > { %v602_v54 = vpop.permute.xlu1 %601 }
 0x294   : > { %v626_v17 = vsel %vm625_vm2, %v602_v54, %v604_v52 }
 0x295   : > { %v579_v55 = vpop.permute.xlu0 %578 }
 0x296   : > { %v591_v19 = vsel %vm584_vm3, %v579_v55, %v581_v53 }
 0x297   : > { %v575_v56 = vpop.permute.xlu1 %574 }
 0x299   : > { %v569_v57 = vpop.permute.xlu0 %568 }
 0x29b   : > { %v573_v58 = vpop.permute.xlu1 %572 }
 0x29c   : > { %v589_v26 = vsel %vm584_vm3, %v573_v58, %v575_v56 }
 0x29d   : > { %v567_v59 = vpop.permute.xlu0 %566 }
 0x29e   : > { %v587_v30 = vsel %vm584_vm3, %v567_v59, %v569_v57 }
 0x29f   : > { %v563_v60 = vpop.permute.xlu1 %562 }
 0x2a1   : > { %v618_v61 = vpop.permute.xlu0 %617 }
 0x2a2   : > { %v631_v1 = vsel %vm625_vm2, %v616_v37, %v618_v61 }
 0x2a3   : > { %v624_v62 = vpop.permute.xlu1 %623 }
 0x2a4   : > { %v633_v63 = vsel %vm625_vm2, %v622_v36, %v624_v62 }
 0x2a5   : > { %655 = vmatprep.subr.mxu0 %v633_v63  ;;  %v606_v3 = vpop.permute.xlu0 %605 }
 0x2a6   : > { %656 = vmatpush1.msra.mxu0 %v632_v0  ;;  %v627_v12 = vsel %vm625_vm2, %v604_v52, %v606_v3 }
 0x2a7   : > { %657 = vmatprep.subr.mxu0 %v631_v1  ;;  %v612_v4 = vpop.permute.xlu1 %611 }
 0x2a8   : > { %658 = vmatpush1.msra.mxu0 %v630_v5  ;;  %v629_v8 = vsel %vm625_vm2, %v610_v50, %v612_v4 }
 0x2a9   : > { %659 = vmatprep.subr.mxu0 %v629_v8  ;;  %v577_v14 = vpop.permute.xlu0 %576 }
 0x2aa   : > { %660 = vmatpush1.msra.mxu0 %v628_v11  ;;  %v590_v22 = vsel %vm584_vm3, %v575_v56, %v577_v14 }
 0x2ab   : > { %661 = vmatprep.subr.mxu0 %v627_v12  ;;  %v583_v15 = vpop.permute.xlu1 %582 }
 0x2ac   : > { %662 = vmatpush1.msra.mxu0 %v626_v17  ;;  %v592_v18 = vsel %vm584_vm3, %v581_v53, %v583_v15 }
 0x2ad   : > { %663 = vmatprep.subr.mxu0 %v592_v18  ;;  %v565_v24 = vpop.permute.xlu0 %564 }
 0x2ae   : > { %664 = vmatpush1.msra.mxu0 %v591_v19  ;;  %v586_v31 = vsel %vm584_vm3, %v563_v60, %v565_v24 }
 0x2af   : > { %665 = vmatprep.subr.mxu0 %v590_v22  ;;  %v571_v25 = vpop.permute.xlu1 %570 }
 0x2b0   : > { %666 = vmatpush1.msra.mxu0 %v589_v26  ;;  %v588_v29 = vsel %vm584_vm3, %v569_v57, %v571_v25 }
 0x2b1   : > { %667 = vmatprep.subr.mxu0 %v588_v29 }
 0x2b2   : > { %668 = vmatpush1.msra.mxu0 %v587_v30 }
 0x2b3   : > { %669 = vmatprep.subr.mxu0 %v586_v31  ;;  %v561_v36 = vpop.permute.xlu1 %560 }
 0x2b4   : > { %v585_v37 = vsel %vm584_vm3, %v561_v36, %v563_v60 }
 0x2b5   : > { %670 = vmatpush1.msra.mxu0 %v585_v37 }
 0x2b6   : > { %671 = vmatprep.subr.mxu0 %v1446_v2  ;;  %v718_v2 = vld [vmem:[#allocation2] sm:$0xff] }
 0x2b7   : > { %672 = vmatpush1.msra.mxu0 %v1451_v6  ;;  %v719_v6 = vld [vmem:[#allocation2 + $0x8] sm:$0xff]  ;;  %720 = vst [vmem:[%s1431_s9] sm:$0xff] %v718_v2 }
 0x2b8   : > { %673 = vmatprep.subr.mxu0 %v1454_v7  ;;  %721 = vst [vmem:[%s1431_s9 + $0x8] sm:$0xff] %v719_v6 }
 0x2b9   : > { %674 = vmatpush1.msra.mxu0 %v1461_v13 }
 0x2ba   : > { %675 = vmatprep.subr.mxu0 %v1466_v16 }
 0x2bb   : > { %676 = vmatpush1.msra.mxu0 %v1471_v20 }
 0x2bc   : > { %677 = vmatprep.subr.mxu0 %v1474_v21 }
 0x2bd   : > { %678 = vmatpush1.msra.mxu0 %v1481_v23 }
 0x2be   : > { %898 = vmatmul.mubr.msk.f32.vlgmr.msra.gmra.mxu0 %vm643_vm4, %v642_v42 }
 0x37e   : > { %v713_v7 = vpop.f32.mrf.mxu0 }
 0x37f   : > { %722 = vst [vmem:[%s1431_s9 + $0x10] sm:$0xff] %v713_v7 }
 0x380   : > { %v715_v13 = vpop.f32.mrf.mxu0 }
 0x381   : > { %723 = vst [vmem:[%s1431_s9 + $0x18] sm:$0xff] %v715_v13 }
 0x382 PF: > { %p899_p8 = scmp.ne.s32.totalorder %s1157_s27, 0 }
 0x384   : > { %727 = sbr.rel (%p899_p8) target bundleno = 908 (0x38c), region = 56 }
 0x389   : > { %vm728_vm5 = vcmask 7168   ;;  %v1182_v16 = vmov 0.0  }
 0x38a   : > { %729 = vst.msk [vmem:[#allocation4] sm:$0xff] %vm728_vm5, %v1182_v16  ;;  %730 = vst.msk [vmem:[#allocation4 + $0x8] sm:$0xff] %vm728_vm5, %v1182_v16 }
 0x38b   : > { %731 = vst.msk [vmem:[#allocation4 + $0x10] sm:$0xff] %vm728_vm5, %v1182_v16  ;;  %732 = vst.msk [vmem:[#allocation4 + $0x18] sm:$0xff] %vm728_vm5, %v1182_v16 }
 0x38c PF: > { %735 = sbr.rel (%p897_p10) target bundleno = 1034 (0x40a), region = 60  ;;  %s1183_s26 = smov (!%p897_p10), 1  }
 0x391   : > { %v738_v20 = vld [vmem:[#allocation3 + $0x38] sm:$0xff]  ;;  %v736_v21 = vld [vmem:[#allocation3 + $0x10] sm:$0xff]  ;;  %v739_v23 = vld [vmem:[#allocation3] sm:$0xff]  ;;  %vm756_vm6 = vcmask 7168  }
 0x392   : > { %748 = vrot.lane.b32.xlu1 %v738_v20, %s1183_s26  ;;  %744 = vrot.lane.b32.xlu0 %v736_v21, %s1183_s26  ;;  %v737_v43 = vld [vmem:[#allocation3 + $0x18] sm:$0xff] }
 0x396   : > { %750 = vrot.lane.b32.xlu1 %v739_v23, %s1183_s26  ;;  %746 = vrot.lane.b32.xlu0 %v737_v43, %s1183_s26 }
 0x404   : > { %v749_v50 = vpop.permute.xlu1 %748  ;;  %v745_v51 = vpop.permute.xlu0 %744 }
 0x405   : > { %759 = vst.msk [vmem:[#allocation4 + $0x10] sm:$0xff] %vm756_vm6, %v749_v50  ;;  %757 = vst.msk [vmem:[#allocation4] sm:$0xff] %vm756_vm6, %v745_v51 }
 0x408   : > { %v751_v52 = vpop.permute.xlu1 %750  ;;  %v747_v53 = vpop.permute.xlu0 %746 }
 0x409   : > { %760 = vst.msk [vmem:[#allocation4 + $0x18] sm:$0xff] %vm756_vm6, %v751_v52  ;;  %758 = vst.msk [vmem:[#allocation4 + $0x8] sm:$0xff] %vm756_vm6, %v747_v53 }
 0x40a PF: > { %761 = vst [vmem:[#allocation3 + $0x28] sm:$0xff] %v455_v32  ;;  %762 = vst [vmem:[#allocation3 + $0x10] sm:$0xff] %v456_v38  ;;  %s902_s11 = sadd.s32 4294967295, %s1157_s27  ;;  %s904_s24 = sshll.u32 %s1161_s28, 4 }
 0x40b   : > { %763 = vst [vmem:[#allocation3 + $0x8] sm:$0xff] %v457_v44  ;;  %764 = vst [vmem:[#allocation3 + $0x18] sm:$0xff] %v458_v48  ;;  %p780_p9 = scmp.gt.s32.totalorder %s902_s11, 0  ;;  %s790_s15 = sshll.u32 %s1431_s9, 4  ;;  %s1556_s15 = int_to_ptr.vmem [resolvable:$true] %s790_s15 }
 0x40c   : > { %765 = vst [vmem:[#allocation3 + $0x20] sm:$0xff] %v459_v33  ;;  %766 = vst [vmem:[#allocation3 + $0x38] sm:$0xff] %v460_v39  ;;  %s1655_s12 = sld [smem:[#allocation18_spill]]  ;;  %s1565_s17 = scalar_lea.sflag [#allocation7], %s295_s18 }
 0x40d   : > { %767 = vst [vmem:[#allocation3 + $0x30] sm:$0xff] %v461_v45  ;;  %768 = vst [vmem:[#allocation3] sm:$0xff] %v462_v49  ;;  %s1682_s11 = smov (!%p780_p9, %s902_s11), 0  ;;  %s1053_s27 = scalar_lea.vmem %s1556_s15, 512 }
 0x40e   : > { %769 = vst [vmem:[#allocation2] sm:$0xff] %v1388_v9  ;;  %770 = vst [vmem:[#allocation2 + $0x8] sm:$0xff] %v1390_v10  ;;  %s903_s20 = sshll.u32 %s1682_s11, 1  ;;  %p1054_p11 = scmp.ne.s32.totalorder %s1556_s15, %s1053_s27 }
 0x40f   : > { %s787_s14 = sadd.s32 %s904_s24, %s903_s20  ;;  %s1184_s28 = smov [#allocation8]  }
 0x410   : > { %s905_s6 = sshll.u32 %s787_s14, 7  ;;  %p1055_p12 = pnand %p1054_p11, %p1322_p1 }
 0x411   : > { %s1057_s9 = sshll.u32 %s1184_s28, 4  ;;  %s1058_s9 = int_to_ptr.vmem [resolvable:$false] %s1057_s9 }
 0x412   : > { %s1561_s16 = scalar_lea.hbm %s1655_s12, %s905_s6  ;;  %p1056_p13 = pneg %p1055_p12 }
 0x413   : > { %s1059_s8 = scalar_lea.vmem %s1058_s9, 1024  ;;  %p1060_p0 = scmp.lt.s32.totalorder %s1556_s15, %s1058_s9 }
 0x414   : > { %p1061_p2 = scmp.lt.s32.totalorder %s1059_s8, %s1053_s27 }
 0x416   : > { %p1062_p7 = por %p1061_p2, %p1060_p0 }
 0x418   : > { %p1063_p3 = pnand %p1062_p7, %p1056_p13 }
 0x41a   : > { %1066 = shalt.err (!%p1063_p3)
}
 0x41b   : > { %s1067_s18 = scalar_lea.hbm %s1561_s16, 512  ;;  %s1071_s24 = scalar_lea.hbm %s1655_s12, 4096 }
 0x41c   : > { %p1068_p4 = scmp.ne.s32.totalorder %s1561_s16, %s1067_s18  ;;  %p1072_p5 = scmp.lt.s32.totalorder %s1561_s16, %s1655_s12 }
 0x41d   : > { %p1073_p8 = scmp.lt.s32.totalorder %s1071_s24, %s1067_s18 }
 0x41e   : > { %p1069_p6 = pnand %p1068_p4, %p1322_p1 }
 0x41f   : > { %p1074_p9 = por %p1073_p8, %p1072_p5 }
 0x420   : > { %p1070_p10 = pneg %p1069_p6 }
 0x422   : > { %p1075_p11 = pnand %p1074_p9, %p1070_p10 }
 0x424   : > { %1078 = shalt.err (!%p1075_p11)
}
 0x425   : > { %s1185_s6 = smov 256   ;;  %s1186_s21 = smov 1024  }
 0x426   : > { %s1187_s13 = smov 16  }
 0x427   : > { %912 = dma.vmem_to_hbm [thread:$0]  (%p1322_p1), %s1556_s15, 512, %s1561_s16, %s1565_s17, %s1185_s6, %s1186_s21, %s1187_s13  }
 0x428 PF: > { %s1656_s27 = sld [smem:[#allocation11_spill]]  ;;  %p923_p12 = scmp.ge.s32.totalorder %s1173_s7, 2 }
 0x429   : > { %p1657_p13 = scmp.ne.s32.totalorder %s1652_s10, 0 }
 0x42b   : > { %p919_p0 = pnand %p923_p12, %p1657_p13 }
 0x42d   : > { %p920_p2 = pneg %p919_p0 }
 0x42e   : > { %s805_s28 = sand.u32 1, %s1656_s27  }
 0x42f   : > { %s806_s9 = scalar_lea.sflag [#allocation7], %s805_s28 }
 0x430   : > { %1128 = dma.done.wait (%p920_p2), %s806_s9, 512  }
 0x431   : > { %1130 = vsyncadd (%p920_p2), %s806_s9, 4294966784  ;;  %s22_s7 = sadd.s32 1, %s1173_s7   ;;  %s1658_s19 = sld [smem:[#allocation12_spill]] }
 0x432   : > { %p19_p7 = scmp.ge.s32.totalorder %s22_s7, 12   ;;  %s1659_s26 = sld [smem:[#allocation16_spill]] }
 0x433   : > { %s1660_s27 = sld [smem:[#allocation13_spill]]  ;;  %s1663_s21 = smov %s1137_s22 }
 0x434   : > { %s1661_s15 = sld [smem:[#allocation14_spill]]  ;;  %s1664_s22 = smov %s1141_s23 }
 0x435   : > { %s1662_s16 = sld [smem:[#allocation15_spill]]  ;;  %s1665_s23 = smov %s1337_s29 }
 0x436   : > { %s1666_s24 = smov %s1149_s25  ;;  %s1668_s28 = smov %s1169_s30 }
 0x437   : > { %s1667_s25 = smov %s1658_s19  ;;  %21 = sbr.rel (!%p19_p7) target bundleno = 11 (0xb), region = 101 }
 0x43a   : > { %s1669_s29 = smov %s1661_s15 }
 0x43b   : > { %s1670_s30 = smov %s1662_s16 }
 0x43c   :  { %811 = vsyncpa [#allocation6], 1 }
 0x43d   :  { %813 = vsyncpa [#allocation6 + $0x1], 1 }
 0x43e   :  { %814 = vsyncpa [#allocation7], 1 }
 0x43f   :  { %816 = vsyncpa [#allocation7 + $0x1], 1 }

</bundles_post_ra>
